<compile_context>
chip_gen: v7x
topology: tpu7x:2x2x1
jax: 0.10.0
libtpu: 0.0.40
codegen_flags: <defaults>
</compile_context>

<pallas_src>
import functools

import jax
import jax.numpy as jnp
from jax.experimental import pallas as pl
from jax.experimental.pallas import tpu as pltpu

# Logical layer widths of the PyTorch module.
H1 = 200
H2 = 500

# Lane-aligned (multiple-of-128) widths used inside the kernel.
H1_PAD = 256
H2_PAD = 512
OUT_PAD = 128
NEG_INF = -1e30  # must stay f32: in bf16 this becomes -inf and z - max can NaN


def _leaky_relu(x, slope=0.01):  # PyTorch nn.LeakyReLU default slope
    return jnp.where(x > 0, x, slope * x)


def _round_up(n, m):
    return ((n + m - 1) // m) * m


def mlp_kernel(x_ref, w1_ref, b1_ref, w2_ref, b2_ref, w3_ref, b3_ref, o_ref):
    # x: (TB, obs) bf16, weights bf16, biases f32; MXU accumulates in f32.
    h1 = jnp.dot(x_ref[...], w1_ref[...], preferred_element_type=jnp.float32)
    h1 = _leaky_relu(h1 + b1_ref[...])

    h2 = jnp.dot(h1.astype(jnp.bfloat16), w2_ref[...],
                 preferred_element_type=jnp.float32)
    h2 = _leaky_relu(h2 + b2_ref[...])

    z = jnp.dot(h2.astype(jnp.bfloat16), w3_ref[...],
                preferred_element_type=jnp.float32)
    z = z + b3_ref[...]  # padded logit columns carry -1e30 -> exactly 0 after exp

    # Numerically stable softmax over the lane-dense (128-wide) logits.
    # Exact f32 divide for normalization: approx reciprocal left row sums
    # ~1e-3 away from 1.0, which is not acceptable for probability outputs.
    z = z - jnp.max(z, axis=1, keepdims=True)
    e = jnp.exp(z)
    denom = jnp.sum(e, axis=1, keepdims=True)
    o_ref[...] = (e / denom).astype(o_ref.dtype)


@functools.partial(jax.jit, static_argnames=("action_size", "block_b"))
def net_forward(x, padded, *, action_size, block_b=512):
    """x: (B, obs_size) f32. padded: dict from pad_params(). Returns (B, action_size) bf16."""
    assert action_size <= OUT_PAD, "action_size must be <= 128 (OUT_PAD)"
    assert padded["b3"].dtype == jnp.float32, "b3 must stay f32 (carries -1e30 pad bias)"

    b, obs = x.shape
    # Batch tile: multiple of 16 rows (bf16 sublane packing), big enough to
    # amortize per-grid-step overhead.
    tb = min(_round_up(block_b, 16), _round_up(b, 16))
    b_pad = _round_up(b, tb)
    # v7x has 2 TensorCores: when the batch is big enough, guarantee >= 2
    # parallel batch tiles so the second core is not idle.
    if b_pad // tb < 2 and b_pad >= 32:
        tb = _round_up(b_pad // 2, 16)
        b_pad = _round_up(b, tb)
    grid = (b_pad // tb,)

    # Skip the extra HBM pad/copy when the batch is already tile-aligned.
    if b_pad == b:
        x_p = x.astype(jnp.bfloat16)
    else:
        x_p = jnp.zeros((b_pad, obs), jnp.bfloat16).at[:b].set(x.astype(jnp.bfloat16))

    def resident(shape):  # weights/biases: same block every grid step (stay in VMEM)
        return pl.BlockSpec(shape, lambda i: (0, 0))

    flops = 2 * b_pad * (obs * H1_PAD + H1_PAD * H2_PAD + H2_PAD * OUT_PAD)
    bytes_accessed = (
        int(x_p.size) * 2
        + sum(int(v.size) * v.dtype.itemsize for v in padded.values())
        + b_pad * OUT_PAD * 2  # bf16 output
    )
    cost = pl.CostEstimate(flops=flops,
                           transcendentals=b_pad * OUT_PAD,
                           bytes_accessed=bytes_accessed)

    out = pl.pallas_call(
        mlp_kernel,
        out_shape=jax.ShapeDtypeStruct((b_pad, OUT_PAD), jnp.bfloat16),
        grid=grid,
        in_specs=[
            pl.BlockSpec((tb, obs), lambda i: (i, 0)),   # activations: batch-tiled
            resident((obs, H1_PAD)),
            resident((1, H1_PAD)),
            resident((H1_PAD, H2_PAD)),
            resident((1, H2_PAD)),
            resident((H2_PAD, OUT_PAD)),
            resident((1, OUT_PAD)),
        ],
        out_specs=pl.BlockSpec((tb, OUT_PAD), lambda i: (i, 0)),
        compiler_params=pltpu.CompilerParams(
            dimension_semantics=("parallel",)),        # batch tiles shard over TCs on v7x
        cost_estimate=cost,
    )(x_p, padded["w1"], padded["b1"], padded["w2"], padded["b2"],
      padded["w3"], padded["b3"])

    return out[:b, :action_size]


def init_params(key, obs_size, action_size):
    """PyTorch-style uniform(-1/sqrt(fan_in), 1/sqrt(fan_in)) init.

    Weights stored as (in_features, out_features) — transposed relative to
    torch's nn.Linear weight layout — so the kernel does plain x @ W.
    """
    sizes = [(obs_size, H1), (H1, H2), (H2, action_size)]
    params = {}
    for idx, (fan_in, fan_out) in enumerate(sizes, start=1):
        key, kw, kb = jax.random.split(key, 3)
        bound = 1.0 / jnp.sqrt(jnp.float32(fan_in))
        params[f"w{idx}"] = jax.random.uniform(
            kw, (fan_in, fan_out), jnp.float32, minval=-bound, maxval=bound)
        params[f"b{idx}"] = jax.random.uniform(
            kb, (1, fan_out), jnp.float32, minval=-bound, maxval=bound)
    return params


def pad_params(params):
    """One-time padding to lane-aligned shapes + bf16 weights for the MXU."""
    obs = params["w1"].shape[0]
    action_size = params["w3"].shape[1]
    assert action_size <= OUT_PAD, "action_size must be <= 128 (OUT_PAD)"

    def pad_to(a, shape, fill=0.0):
        out = jnp.full(shape, fill, dtype=a.dtype)
        return out.at[: a.shape[0], : a.shape[1]].set(a)

    return {
        "w1": pad_to(params["w1"], (obs, H1_PAD)).astype(jnp.bfloat16),
        "b1": pad_to(params["b1"], (1, H1_PAD)),
        "w2": pad_to(params["w2"], (H1_PAD, H2_PAD)).astype(jnp.bfloat16),
        "b2": pad_to(params["b2"], (1, H2_PAD)),
        "w3": pad_to(params["w3"], (H2_PAD, OUT_PAD)).astype(jnp.bfloat16),
        # Padded logit columns get a huge negative bias so softmax ignores them.
        # Must remain f32 (see NEG_INF comment above).
        "b3": pad_to(params["b3"], (1, OUT_PAD), fill=NEG_INF),
    }


def reference_forward(x, params):
    """Pure-JAX f32 reference matching the PyTorch module."""
    h1 = _leaky_relu(x @ params["w1"] + params["b1"])
    h2 = _leaky_relu(h1 @ params["w2"] + params["b2"])
    z = h2 @ params["w3"] + params["b3"]
    return jax.nn.softmax(z, axis=1)


def _check(out, ref, n_rows):
    out_f = out.astype(jnp.float32)
    # bf16 MXU operands + bf16 output -> loosened tolerances vs f32 reference.
    assert jnp.allclose(out_f, ref, atol=3e-2, rtol=0)
    # Normalization is exact in f32 inside the kernel; residual error is only
    # the final bf16 cast of each probability.
    assert jnp.allclose(jnp.sum(out_f, axis=1), jnp.ones((n_rows,)), atol=1e-2)


if __name__ == "__main__":
    B, OBS, ACT = 4, 32, 6  # Space Invaders: small synthetic obs, 6 actions
    key = jax.random.PRNGKey(0)
    key, kx = jax.random.split(key)
    x = jax.random.normal(kx, (B, OBS), jnp.float32)
    params = init_params(key, OBS, ACT)
    padded = pad_params(params)

    out = jax.block_until_ready(net_forward(x, padded, action_size=ACT))
    assert out.shape == (B, ACT)
    _check(out, reference_forward(x, params), B)

    # Multi-tile grid path (batch not a multiple of the 16-row tile).
    B2 = 20
    key, kx2 = jax.random.split(key)
    x2 = jax.random.normal(kx2, (B2, OBS), jnp.float32)
    out2 = jax.block_until_ready(net_forward(x2, padded, action_size=ACT, block_b=16))
    assert out2.shape == (B2, ACT)
    _check(out2, reference_forward(x2, params), B2)

    # Default tile with the ">= 2 grid steps" split (40 rows -> 2 tiles of 32).
    B3 = 40
    key, kx3 = jax.random.split(key)
    x3 = jax.random.normal(kx3, (B3, OBS), jnp.float32)
    out3 = jax.block_until_ready(net_forward(x3, padded, action_size=ACT))
    assert out3.shape == (B3, ACT)
    _check(out3, reference_forward(x3, params), B3)

    print("KERNEL_OK")
</pallas_src>

<mosaic_0001>
module attributes {stable_mosaic.version = 11 : i64} {
  func.func @mlp_kernel(%arg0: i32, %arg1: memref<16x32xbf16, #tpu.memory_space<vmem>>, %arg2: memref<32x256xbf16, #tpu.memory_space<vmem>>, %arg3: memref<1x256xf32, #tpu.memory_space<vmem>>, %arg4: memref<256x512xbf16, #tpu.memory_space<vmem>>, %arg5: memref<1x512xf32, #tpu.memory_space<vmem>>, %arg6: memref<512x128xbf16, #tpu.memory_space<vmem>>, %arg7: memref<1x128xf32, #tpu.memory_space<vmem>>, %arg8: memref<16x128xbf16, #tpu.memory_space<vmem>>) attributes {dimension_semantics = [#tpu.dimension_semantics<parallel>], iteration_bounds = array<i64: 1>, scalar_prefetch = 0 : i64, scratch_operands = 0 : i64, tpu.core_type = #tpu.core_type<tc>, window_params = [{transform_indices = @transform_0, window_bounds = array<i64: 16, 32>}, {pipeline_mode = #tpu.pipeline_mode<synchronous>, transform_indices = @transform_1, window_bounds = array<i64: 32, 256>}, {pipeline_mode = #tpu.pipeline_mode<synchronous>, transform_indices = @transform_2, window_bounds = array<i64: 1, 256>}, {pipeline_mode = #tpu.pipeline_mode<synchronous>, transform_indices = @transform_3, window_bounds = array<i64: 256, 512>}, {pipeline_mode = #tpu.pipeline_mode<synchronous>, transform_indices = @transform_4, window_bounds = array<i64: 1, 512>}, {pipeline_mode = #tpu.pipeline_mode<synchronous>, transform_indices = @transform_5, window_bounds = array<i64: 512, 128>}, {pipeline_mode = #tpu.pipeline_mode<synchronous>, transform_indices = @transform_6, window_bounds = array<i64: 1, 128>}, {transform_indices = @transform_7, window_bounds = array<i64: 16, 128>}]} {
    %c0 = arith.constant 0 : index
    %c0_0 = arith.constant 0 : index
    %0 = vector.load %arg1[%c0, %c0_0] : memref<16x32xbf16, #tpu.memory_space<vmem>>, vector<16x32xbf16>
    %c0_1 = arith.constant 0 : index
    %c0_2 = arith.constant 0 : index
    %1 = vector.load %arg2[%c0_1, %c0_2] : memref<32x256xbf16, #tpu.memory_space<vmem>>, vector<32x256xbf16>
    %cst = arith.constant dense<0.000000e+00> : vector<16x256xf32>
    %2 = tpu.matmul %0, %1, %cst {dimension_numbers = #tpu.dot_dimension_numbers<[1], [0], [0], [1], [0, 0, 1, 1], [], []>} : vector<16x32xbf16>, vector<32x256xbf16>, vector<16x256xf32> -> vector<16x256xf32>
    %c0_3 = arith.constant 0 : index
    %c0_4 = arith.constant 0 : index
    %3 = vector.load %arg3[%c0_3, %c0_4] : memref<1x256xf32, #tpu.memory_space<vmem>>, vector<1x256xf32>
    %4 = vector.broadcast %3 : vector<1x256xf32> to vector<16x256xf32>
    %5 = arith.addf %2, %4 : vector<16x256xf32>
    %cst_5 = arith.constant 0.000000e+00 : f32
    %6 = vector.broadcast %cst_5 : f32 to vector<16x256xf32>
    %7 = arith.cmpf ogt, %5, %6 : vector<16x256xf32>
    %cst_6 = arith.constant 0.00999999977 : f32
    %8 = vector.broadcast %cst_6 : f32 to vector<16x256xf32>
    %9 = arith.mulf %8, %5 : vector<16x256xf32>
    %10 = arith.select %7, %5, %9 : vector<16x256xi1>, vector<16x256xf32>
    %11 = arith.truncf %10 : vector<16x256xf32> to vector<16x256xbf16>
    %c0_7 = arith.constant 0 : index
    %c0_8 = arith.constant 0 : index
    %12 = vector.load %arg4[%c0_7, %c0_8] : memref<256x512xbf16, #tpu.memory_space<vmem>>, vector<256x512xbf16>
    %cst_9 = arith.constant dense<0.000000e+00> : vector<16x512xf32>
    %13 = tpu.matmul %11, %12, %cst_9 {dimension_numbers = #tpu.dot_dimension_numbers<[1], [0], [0], [1], [0, 0, 1, 1], [], []>} : vector<16x256xbf16>, vector<256x512xbf16>, vector<16x512xf32> -> vector<16x512xf32>
    %c0_10 = arith.constant 0 : index
    %c0_11 = arith.constant 0 : index
    %14 = vector.load %arg5[%c0_10, %c0_11] : memref<1x512xf32, #tpu.memory_space<vmem>>, vector<1x512xf32>
    %15 = vector.broadcast %14 : vector<1x512xf32> to vector<16x512xf32>
    %16 = arith.addf %13, %15 : vector<16x512xf32>
    %cst_12 = arith.constant 0.000000e+00 : f32
    %17 = vector.broadcast %cst_12 : f32 to vector<16x512xf32>
    %18 = arith.cmpf ogt, %16, %17 : vector<16x512xf32>
    %cst_13 = arith.constant 0.00999999977 : f32
    %19 = vector.broadcast %cst_13 : f32 to vector<16x512xf32>
    %20 = arith.mulf %19, %16 : vector<16x512xf32>
    %21 = arith.select %18, %16, %20 : vector<16x512xi1>, vector<16x512xf32>
    %22 = arith.truncf %21 : vector<16x512xf32> to vector<16x512xbf16>
    %c0_14 = arith.constant 0 : index
    %c0_15 = arith.constant 0 : index
    %23 = vector.load %arg6[%c0_14, %c0_15] : memref<512x128xbf16, #tpu.memory_space<vmem>>, vector<512x128xbf16>
    %cst_16 = arith.constant dense<0.000000e+00> : vector<16x128xf32>
    %24 = tpu.matmul %22, %23, %cst_16 {dimension_numbers = #tpu.dot_dimension_numbers<[1], [0], [0], [1], [0, 0, 1, 1], [], []>} : vector<16x512xbf16>, vector<512x128xbf16>, vector<16x128xf32> -> vector<16x128xf32>
    %c0_17 = arith.constant 0 : index
    %c0_18 = arith.constant 0 : index
    %25 = vector.load %arg7[%c0_17, %c0_18] : memref<1x128xf32, #tpu.memory_space<vmem>>, vector<1x128xf32>
    %26 = vector.broadcast %25 : vector<1x128xf32> to vector<16x128xf32>
    %27 = arith.addf %24, %26 : vector<16x128xf32>
    %cst_19 = arith.constant dense<0xFF800000> : vector<16xf32>
    %28 = vector.multi_reduction <maximumf>, %27, %cst_19 [1] : vector<16x128xf32> to vector<16xf32>
    %29 = vector.shape_cast %28 : vector<16xf32> to vector<16x1xf32>
    %30 = vector.broadcast %29 : vector<16x1xf32> to vector<16x128xf32>
    %31 = arith.subf %27, %30 : vector<16x128xf32>
    %32 = math.exp %31 : vector<16x128xf32>
    %cst_20 = arith.constant dense<0.000000e+00> : vector<16xf32>
    %33 = vector.multi_reduction <add>, %32, %cst_20 [1] : vector<16x128xf32> to vector<16xf32>
    %34 = vector.shape_cast %33 : vector<16xf32> to vector<16x1xf32>
    %35 = vector.broadcast %34 : vector<16x1xf32> to vector<16x128xf32>
    %36 = arith.divf %32, %35 : vector<16x128xf32>
    %37 = arith.truncf %36 : vector<16x128xf32> to vector<16x128xbf16>
    %c0_21 = arith.constant 0 : index
    %c0_22 = arith.constant 0 : index
    %38 = vector.load %arg8[%c0_21, %c0_22] : memref<16x128xbf16, #tpu.memory_space<vmem>>, vector<16x128xbf16>
    tpu.vector_store %arg8[%c0_21, %c0_22], %37 {strides = array<i32>} : memref<16x128xbf16, #tpu.memory_space<vmem>>, vector<16x128xbf16>,
    return
  }
  func.func @transform_0(%arg0: i32) -> (i32, i32) {
    %c0_i32 = arith.constant 0 : i32
    %c0_i32_0 = arith.constant 0 : i32
    return %arg0, %c0_i32 : i32, i32
  }
  func.func @transform_1(%arg0: i32) -> (i32, i32) {
    %c0_i32 = arith.constant 0 : i32
    %c0_i32_0 = arith.constant 0 : i32
    %c0_i32_1 = arith.constant 0 : i32
    return %c0_i32, %c0_i32_0 : i32, i32
  }
  func.func @transform_2(%arg0: i32) -> (i32, i32) {
    %c0_i32 = arith.constant 0 : i32
    %c0_i32_0 = arith.constant 0 : i32
    %c0_i32_1 = arith.constant 0 : i32
    return %c0_i32, %c0_i32_0 : i32, i32
  }
  func.func @transform_3(%arg0: i32) -> (i32, i32) {
    %c0_i32 = arith.constant 0 : i32
    %c0_i32_0 = arith.constant 0 : i32
    %c0_i32_1 = arith.constant 0 : i32
    return %c0_i32, %c0_i32_0 : i32, i32
  }
  func.func @transform_4(%arg0: i32) -> (i32, i32) {
    %c0_i32 = arith.constant 0 : i32
    %c0_i32_0 = arith.constant 0 : i32
    %c0_i32_1 = arith.constant 0 : i32
    return %c0_i32, %c0_i32_0 : i32, i32
  }
  func.func @transform_5(%arg0: i32) -> (i32, i32) {
    %c0_i32 = arith.constant 0 : i32
    %c0_i32_0 = arith.constant 0 : i32
    %c0_i32_1 = arith.constant 0 : i32
    return %c0_i32, %c0_i32_0 : i32, i32
  }
  func.func @transform_6(%arg0: i32) -> (i32, i32) {
    %c0_i32 = arith.constant 0 : i32
    %c0_i32_0 = arith.constant 0 : i32
    %c0_i32_1 = arith.constant 0 : i32
    return %c0_i32, %c0_i32_0 : i32, i32
  }
  func.func @transform_7(%arg0: i32) -> (i32, i32) {
    %c0_i32 = arith.constant 0 : i32
    %c0_i32_0 = arith.constant 0 : i32
    return %arg0, %c0_i32 : i32, i32
  }
}

</mosaic_0001>

<bundles_post_ra>
// kernel: net_forward.1
= control target key start
LH: loop header
LB: loop body
LE: loop exit
PB: predicated region body
PF: predicated region fallthrough
CT: control target
= control target key end

     0   :  { %12 = vsyncpa [#allocation3], 0  ;;  %s1662_s0 = inlined_call_operand.vmem [shape: bf16[16,32], index: 0, kind: input, shape index: {}]   ;;  %s1663_s1 = inlined_call_operand.vmem [shape: bf16[32,256], index: 1, kind: input, shape index: {}]   ;;  %s1664_s2 = inlined_call_operand.hbm [shape: f32[1,256], index: 2, kind: input, shape index: {}]   ;;  %s1665_s3 = inlined_call_operand.hbm [shape: bf16[256,512], index: 3, kind: input, shape index: {}]   ;;  %s1666_s4 = inlined_call_operand.hbm [shape: f32[1,512], index: 4, kind: input, shape index: {}]   ;;  %s1667_s5 = inlined_call_operand.hbm [shape: bf16[512,128], index: 5, kind: input, shape index: {}]   ;;  %s1668_s6 = inlined_call_operand.hbm [shape: f32[1,128], index: 6, kind: input, shape index: {}]   ;;  %s1669_s7 = inlined_call_operand.vmem [shape: bf16[16,128], index: 7, kind: output, shape index: {}]  }
   0x1   :  { %13 = vsyncpa [#allocation5], 0 }
   0x2   :  { %14 = vsyncpa [#allocation8], 0  ;;  %s1518_s24 = smov [#allocation4]   ;;  %s1402_s28 = scalar_lea.hbm %s1665_s3, 8192 }
   0x3   :  { %s34_s25 = sshll.u32 %s1518_s24, 4  ;;  %p1403_p0 = scmp.ne.s32.totalorder %s1665_s3, %s1402_s28  ;;  %s35_s25 = int_to_ptr.vmem [resolvable:$true] %s34_s25 }
   0x4   :  { %p1406_p1 = scmp.lt.u32.totalorder %s1402_s28, %s1665_s3 }
   0x6   :  { %p1408_p2 = pnand %p1406_p1, %p1403_p0 }
   0x8   :  { %1411 = shalt.err (!%p1408_p2)
}
   0x9   :  { %s1412_s10 = scalar_lea.vmem %s35_s25, 8192  ;;  %p1417_p4 = scmp.lt.s32.totalorder %s35_s25, %s35_s25 }
   0xa   :  { %p1413_p3 = scmp.ne.s32.totalorder %s35_s25, %s1412_s10  ;;  %p1418_p5 = scmp.lt.s32.totalorder %s1412_s10, %s1412_s10 }
   0xc   :  { %p1419_p6 = por %p1418_p5, %p1417_p4 }
   0xe   :  { %p1420_p7 = pnand %p1419_p6, %p1413_p3 }
  0x10   :  { %1423 = shalt.err (!%p1420_p7)
}
  0x11   :  { %s1519_s11 = smov 256   ;;  %s1520_s12 = smov 16  }
  0x12   :  { %40 = dma.hbm_to_vmem [thread:$0]  %s1665_s3, 8192, %s35_s25, [#allocation5], %s1519_s11, %s1519_s11, %s1520_s12  }
  0x13   :  { %s1521_s15 = smov [#allocation7]   ;;  %s1424_s19 = scalar_lea.hbm %s1667_s5, 4096 }
  0x14   :  { %s56_s16 = sshll.u32 %s1521_s15, 4  ;;  %p1425_p8 = scmp.ne.s32.totalorder %s1667_s5, %s1424_s19  ;;  %s57_s16 = int_to_ptr.vmem [resolvable:$true] %s56_s16 }
  0x15   :  { %p1428_p9 = scmp.lt.u32.totalorder %s1424_s19, %s1667_s5 }
  0x17   :  { %p1430_p10 = pnand %p1428_p9, %p1425_p8 }
  0x19   :  { %1433 = shalt.err (!%p1430_p10)
}
  0x1a   :  { %s1434_s24 = scalar_lea.vmem %s57_s16, 4096  ;;  %p1439_p12 = scmp.lt.s32.totalorder %s57_s16, %s57_s16 }
  0x1b   :  { %p1435_p11 = scmp.ne.s32.totalorder %s57_s16, %s1434_s24  ;;  %p1440_p13 = scmp.lt.s32.totalorder %s1434_s24, %s1434_s24 }
  0x1d   :  { %p1441_p0 = por %p1440_p13, %p1439_p12 }
  0x1f   :  { %p1442_p1 = pnand %p1441_p0, %p1435_p11 }
  0x21   :  { %1445 = shalt.err (!%p1442_p1)
}
  0x22   :  { %s1522_s3 = smov 64   ;;  %s1523_s25 = smov 4  }
  0x23   :  { %62 = dma.hbm_to_vmem [thread:$0]  %s1667_s5, 4096, %s57_s16, [#allocation8], %s1522_s3, %s1522_s3, %s1523_s25  }
  0x24   :  { %s1524_s28 = smov [#allocation2]   ;;  %s1525_s30 = smov [#allocation6]  }
  0x25   :  { %s25_s29 = sshll.u32 %s1524_s28, 4  ;;  %s47_s8 = sshll.u32 %s1525_s30, 4  ;;  %s26_s29 = int_to_ptr.vmem [resolvable:$true] %s25_s29  ;;  %s48_s8 = int_to_ptr.vmem [resolvable:$true] %s47_s8 }
  0x26   :  { %s1446_s11 = scalar_lea.hbm %s1664_s2, 32 }
  0x27   :  { %p1447_p2 = scmp.ne.s32.totalorder %s1664_s2, %s1446_s11  ;;  %p1450_p3 = scmp.lt.u32.totalorder %s1446_s11, %s1664_s2 }
  0x29   :  { %p1452_p4 = pnand %p1450_p3, %p1447_p2 }
  0x2b   :  { %1455 = shalt.err (!%p1452_p4)
}
  0x2c   :  { %s1456_s5 = scalar_lea.vmem %s26_s29, 32  ;;  %p1461_p6 = scmp.lt.s32.totalorder %s26_s29, %s26_s29 }
  0x2d   :  { %p1457_p5 = scmp.ne.s32.totalorder %s26_s29, %s1456_s5  ;;  %p1462_p7 = scmp.lt.s32.totalorder %s1456_s5, %s1456_s5 }
  0x2f   :  { %p1463_p8 = por %p1462_p7, %p1461_p6 }
  0x31   :  { %p1464_p9 = pnand %p1463_p8, %p1457_p5 }
  0x33   :  { %1467 = shalt.err (!%p1464_p9)
}
  0x34   :  { %28 = dma.hbm_to_vmem [thread:$0]  %s1664_s2, 32, %s26_s29, [#allocation3]  }
  0x35   :  { %s1468_s20 = scalar_lea.hbm %s1666_s4, 64 }
  0x36   :  { %p1469_p10 = scmp.ne.s32.totalorder %s1666_s4, %s1468_s20  ;;  %p1472_p11 = scmp.lt.u32.totalorder %s1468_s20, %s1666_s4 }
  0x38   :  { %p1474_p12 = pnand %p1472_p11, %p1469_p10 }
  0x3a   :  { %1477 = shalt.err (!%p1474_p12)
}
  0x3b   :  { %s1478_s3 = scalar_lea.vmem %s48_s8, 64  ;;  %p1483_p0 = scmp.lt.s32.totalorder %s48_s8, %s48_s8 }
  0x3c   :  { %p1479_p13 = scmp.ne.s32.totalorder %s48_s8, %s1478_s3  ;;  %p1484_p1 = scmp.lt.s32.totalorder %s1478_s3, %s1478_s3 }
  0x3e   :  { %p1485_p2 = por %p1484_p1, %p1483_p0 }
  0x40   :  { %p1486_p3 = pnand %p1485_p2, %p1479_p13 }
  0x42   :  { %1489 = shalt.err (!%p1486_p3)
}
  0x43   :  { %50 = dma.hbm_to_vmem [thread:$0]  %s1666_s4, 64, %s48_s8, [#allocation5]  }
  0x44   :  { %s1526_s26 = smov [#allocation9]   ;;  %s1490_s30 = scalar_lea.hbm %s1668_s6, 16 }
  0x45   :  { %s69_s27 = sshll.u32 %s1526_s26, 4  ;;  %p1491_p4 = scmp.ne.s32.totalorder %s1668_s6, %s1490_s30  ;;  %s70_s27 = int_to_ptr.vmem [resolvable:$true] %s69_s27 }
  0x46   :  { %p1494_p5 = scmp.lt.u32.totalorder %s1490_s30, %s1668_s6 }
  0x48   :  { %p1496_p6 = pnand %p1494_p5, %p1491_p4 }
  0x4a   :  { %1499 = shalt.err (!%p1496_p6)
}
  0x4b   :  { %s1500_s13 = scalar_lea.vmem %s70_s27, 16  ;;  %s1504_s4 = scalar_lea.vmem %s70_s27, 32 }
  0x4c   :  { %p1501_p7 = scmp.ne.s32.totalorder %s70_s27, %s1500_s13  ;;  %p1505_p8 = scmp.lt.s32.totalorder %s70_s27, %s70_s27 }
  0x4d   :  { %p1506_p9 = scmp.lt.s32.totalorder %s1504_s4, %s1500_s13 }
  0x4f   :  { %p1507_p10 = por %p1506_p9, %p1505_p8 }
  0x51   :  { %p1508_p11 = pnand %p1507_p10, %p1501_p7 }
  0x53   :  { %1511 = shalt.err (!%p1508_p11)
}
  0x54   :  { %72 = dma.hbm_to_vmem [thread:$0]  %s1668_s6, 16, %s70_s27, [#allocation8]  }
  0x55   :  { %1512 = dma.done.wait [#allocation3], 32  }
  0x56   :  { %1513 = vsyncadd [#allocation3], 4294967264 }
  0x57   :  { %1514 = dma.done.wait [#allocation5], 8256  }
  0x58   :  { %1515 = vsyncadd [#allocation5], 4294959040 }
  0x59   :  { %1516 = dma.done.wait [#allocation8], 4112  }
  0x5a   :  { %1517 = vsyncadd [#allocation8], 4294963184  ;;  %v1527_v0 = vmov 0   ;;  %v1259_v1 = vld [vmem:[%s1663_s1 + $0x4] ss:$8 sps:$4 sm:$0xff]   ;;  %vm132_vm0 = vcmask 261120  }
  0x5b   :  { %168 = vmatprep.mubr.bf16.mxu0 %v1527_v0  ;;  %v1261_v2 = vld [vmem:[%s1663_s1] ss:$8 sps:$4 sm:$0xff]   ;;  %136 = vmatprep.subr.bf16.mxu0 %v1259_v1  ;;  %v1262_v3 = vld [vmem:[%s1663_s1 + $0x14] ss:$8 sps:$4 sm:$0xff]   ;;  %v1264_v4 = vld [vmem:[%s1663_s1 + $0x10] ss:$8 sps:$4 sm:$0xff]  }
  0x5c   :  { %137 = vmatpush1.bf16.msra.mxu0 %v1261_v2  ;;  %v1265_v5 = vld [vmem:[%s1662_s0] sm:$0xff]   ;;  %v1268_v7 = vld [vmem:[#allocation4 + $0x8] ss:$16 sps:$4 sm:$0xff]  }
  0x5d   :  { %138 = vmatprep.subr.bf16.mxu0 %v1262_v3  ;;  %v1266_v6 = vld [vmem:[#allocation4 + $0x4] ss:$16 sps:$4 sm:$0xff]   ;;  %v1270_v8 = vld [vmem:[#allocation4 + $0xc] ss:$16 sps:$4 sm:$0xff]   ;;  %v1271_v9 = vld [vmem:[#allocation4] ss:$16 sps:$4 sm:$0xff]  }
  0x5e   :  { %599 = vmatprep.subr.bf16.mxu1 %v1266_v6  ;;  %v1272_v10 = vld [vmem:[#allocation4 + $0x24] ss:$16 sps:$4 sm:$0xff]   ;;  %v1276_v11 = vld [vmem:[#allocation4 + $0x2c] ss:$16 sps:$4 sm:$0xff]   ;;  %v1277_v12 = vld [vmem:[#allocation4 + $0x20] ss:$16 sps:$4 sm:$0xff]  }
  0x5f   :  { %600 = vmatpush1.bf16.msra.mxu1 %v1271_v9  ;;  %v1278_v13 = vld [vmem:[#allocation4 + $0x44] ss:$16 sps:$4 sm:$0xff]   ;;  %v1274_v14 = vld [vmem:[#allocation4 + $0x28] ss:$16 sps:$4 sm:$0xff]   ;;  %v1282_v15 = vld [vmem:[#allocation4 + $0x4c] ss:$16 sps:$4 sm:$0xff]  }
  0x60   :  { %139 = vmatpush1.bf16.msra.mxu0 %v1264_v4  ;;  %601 = vmatprep.subr.bf16.mxu1 %v1272_v10  ;;  %v1283_v16 = vld [vmem:[#allocation4 + $0x40] ss:$16 sps:$4 sm:$0xff]   ;;  %v1284_v17 = vld [vmem:[#allocation4 + $0x64] ss:$16 sps:$4 sm:$0xff]   ;;  %v1280_v18 = vld [vmem:[#allocation4 + $0x48] ss:$16 sps:$4 sm:$0xff]  }
  0x61   :  { %642 = vmatprep.subr.bf16.mxu0 %v1270_v8  ;;  %v1288_v19 = vld [vmem:[#allocation4 + $0x6c] ss:$16 sps:$4 sm:$0xff]   ;;  %v1289_v20 = vld [vmem:[#allocation4 + $0x60] ss:$16 sps:$4 sm:$0xff]   ;;  %v1290_v21 = vld [vmem:[#allocation4 + $0x84] ss:$16 sps:$4 sm:$0xff]   ;;  %v97_v8 = vlaneseq }
  0x62   :  { %v1286_v22 = vld [vmem:[#allocation4 + $0x68] ss:$16 sps:$4 sm:$0xff]   ;;  %v1294_v23 = vld [vmem:[#allocation4 + $0x8c] ss:$16 sps:$4 sm:$0xff]   ;;  %v1295_v24 = vld [vmem:[#allocation4 + $0x80] ss:$16 sps:$4 sm:$0xff]  }
  0x63   :  { %1098 = vmatmul.mubr.msk.bf16.vlgmr.msra.gmra.mrb[0].mxu0 %vm132_vm0, %v1265_v5  ;;  %602 = vmatpush1.bf16.msra.mxu1 %v1277_v12  ;;  %v1296_v25 = vld [vmem:[#allocation4 + $0xa4] ss:$16 sps:$4 sm:$0xff]   ;;  %v1292_v26 = vld [vmem:[#allocation4 + $0x88] ss:$16 sps:$4 sm:$0xff]   ;;  %v1300_v27 = vld [vmem:[#allocation4 + $0xac] ss:$16 sps:$4 sm:$0xff]  }
  0x64   :  { %643 = vmatpush1.bf16.msra.mxu0 %v1268_v7  ;;  %603 = vmatprep.subr.bf16.mxu1 %v1278_v13  ;;  %v1301_v28 = vld [vmem:[#allocation4 + $0xa0] ss:$16 sps:$4 sm:$0xff]   ;;  %v1302_v29 = vld [vmem:[#allocation4 + $0xc4] ss:$16 sps:$4 sm:$0xff]   ;;  %v1298_v30 = vld [vmem:[#allocation4 + $0xa8] ss:$16 sps:$4 sm:$0xff]  }
  0x65   :  { %644 = vmatprep.subr.bf16.mxu0 %v1276_v11  ;;  %v1306_v31 = vld [vmem:[#allocation4 + $0xcc] ss:$16 sps:$4 sm:$0xff]   ;;  %v1307_v32 = vld [vmem:[#allocation4 + $0xc0] ss:$16 sps:$4 sm:$0xff]   ;;  %v1308_v33 = vld [vmem:[#allocation4 + $0xe4] ss:$16 sps:$4 sm:$0xff]  }
  0x66   :  { %v1304_v34 = vld [vmem:[#allocation4 + $0xc8] ss:$16 sps:$4 sm:$0xff]   ;;  %v1312_v35 = vld [vmem:[#allocation4 + $0xec] ss:$16 sps:$4 sm:$0xff]   ;;  %v1313_v36 = vld [vmem:[#allocation4 + $0xe0] ss:$16 sps:$4 sm:$0xff]  }
  0x67   :  { %604 = vmatpush1.bf16.msra.mxu1 %v1283_v16  ;;  %v1314_v37 = vld [vmem:[#allocation4 + $0x104] ss:$16 sps:$4 sm:$0xff]   ;;  %v1310_v38 = vld [vmem:[#allocation4 + $0xe8] ss:$16 sps:$4 sm:$0xff]   ;;  %v1318_v39 = vld [vmem:[#allocation4 + $0x10c] ss:$16 sps:$4 sm:$0xff]  }
  0x68   :  { %645 = vmatpush1.bf16.msra.mxu0 %v1274_v14  ;;  %605 = vmatprep.subr.bf16.mxu1 %v1284_v17  ;;  %v1319_v40 = vld [vmem:[#allocation4 + $0x100] ss:$16 sps:$4 sm:$0xff]   ;;  %v1316_v41 = vld [vmem:[#allocation4 + $0x108] ss:$16 sps:$4 sm:$0xff]   ;;  %v1320_v42 = vld [vmem:[#allocation4 + $0x124] ss:$16 sps:$4 sm:$0xff]  }
  0x69   :  { %646 = vmatprep.subr.bf16.mxu0 %v1282_v15  ;;  %v1324_v43 = vld [vmem:[#allocation4 + $0x12c] ss:$16 sps:$4 sm:$0xff]   ;;  %v1325_v44 = vld [vmem:[#allocation4 + $0x120] ss:$16 sps:$4 sm:$0xff]   ;;  %v1326_v45 = vld [vmem:[#allocation4 + $0x144] ss:$16 sps:$4 sm:$0xff]  }
  0x6a   :  { %v1322_v46 = vld [vmem:[#allocation4 + $0x128] ss:$16 sps:$4 sm:$0xff]   ;;  %v1330_v47 = vld [vmem:[#allocation4 + $0x14c] ss:$16 sps:$4 sm:$0xff]   ;;  %v1331_v48 = vld [vmem:[#allocation4 + $0x140] ss:$16 sps:$4 sm:$0xff]  }
  0x6b   :  { %606 = vmatpush1.bf16.msra.mxu1 %v1289_v20  ;;  %v1332_v49 = vld [vmem:[#allocation4 + $0x164] ss:$16 sps:$4 sm:$0xff]   ;;  %v1328_v50 = vld [vmem:[#allocation4 + $0x148] ss:$16 sps:$4 sm:$0xff]   ;;  %v1336_v51 = vld [vmem:[#allocation4 + $0x16c] ss:$16 sps:$4 sm:$0xff]  }
  0x6c   :  { %647 = vmatpush1.bf16.msra.mxu0 %v1280_v18  ;;  %607 = vmatprep.subr.bf16.mxu1 %v1290_v21  ;;  %v1337_v52 = vld [vmem:[#allocation4 + $0x160] ss:$16 sps:$4 sm:$0xff]   ;;  %v1338_v53 = vld [vmem:[#allocation4 + $0x184] ss:$16 sps:$4 sm:$0xff]   ;;  %v1334_v54 = vld [vmem:[#allocation4 + $0x168] ss:$16 sps:$4 sm:$0xff]  }
  0x6d   :  { %648 = vmatprep.subr.bf16.mxu0 %v1288_v19  ;;  %v1342_v55 = vld [vmem:[#allocation4 + $0x18c] ss:$16 sps:$4 sm:$0xff]   ;;  %v1343_v56 = vld [vmem:[#allocation4 + $0x180] ss:$16 sps:$4 sm:$0xff]   ;;  %v1340_v57 = vld [vmem:[#allocation4 + $0x188] ss:$16 sps:$4 sm:$0xff]  }
  0x6e   :  { %v1344_v58 = vld [vmem:[#allocation4 + $0x1a4] ss:$16 sps:$4 sm:$0xff]   ;;  %v1348_v59 = vld [vmem:[#allocation4 + $0x1ac] ss:$16 sps:$4 sm:$0xff]   ;;  %v1346_v60 = vld [vmem:[#allocation4 + $0x1a8] ss:$16 sps:$4 sm:$0xff]  }
  0x6f   :  { %608 = vmatpush1.bf16.msra.mxu1 %v1295_v24  ;;  %v1349_v61 = vld [vmem:[#allocation4 + $0x1a0] ss:$16 sps:$4 sm:$0xff]   ;;  %v1350_v62 = vld [vmem:[#allocation4 + $0x1c4] ss:$16 sps:$4 sm:$0xff]   ;;  %v1354_v63 = vld [vmem:[#allocation4 + $0x1cc] ss:$16 sps:$4 sm:$0xff]  }
  0x70   :  { %649 = vmatpush1.bf16.msra.mxu0 %v1286_v22  ;;  %609 = vmatprep.subr.bf16.mxu1 %v1296_v25  ;;  %v1352_v0 = vld [vmem:[#allocation4 + $0x1c8] ss:$16 sps:$4 sm:$0xff]   ;;  %v1355_v1 = vld [vmem:[#allocation4 + $0x1c0] ss:$16 sps:$4 sm:$0xff]   ;;  %v1356_v2 = vld [vmem:[#allocation4 + $0x1e4] ss:$16 sps:$4 sm:$0xff]  }
  0x71   :  { %650 = vmatprep.subr.bf16.mxu0 %v1294_v23  ;;  %v1358_v3 = vld [vmem:[#allocation4 + $0x1e8] ss:$16 sps:$4 sm:$0xff]   ;;  %v1360_v4 = vld [vmem:[#allocation4 + $0x1ec] ss:$16 sps:$4 sm:$0xff]   ;;  %v1361_v5 = vld [vmem:[#allocation4 + $0x1e0] ss:$16 sps:$4 sm:$0xff]  }
  0x72   :  { %v1362_v6 = vld [vmem:[#allocation7 + $0x40] sm:$0xff]   ;;  %v1643_v9 = vshrl.u32 %v97_v8, 7  ;;  %v95_v11 = vld [vmem:[#allocation2] sm:$0x3] }
  0x73   :  { %610 = vmatpush1.bf16.msra.mxu1 %v1301_v28  ;;  %v1363_v7 = vld [vmem:[#allocation7 + $0xc0] sm:$0xff]  }
  0x74   :  { %651 = vmatpush1.bf16.msra.mxu0 %v1292_v26  ;;  %611 = vmatprep.subr.bf16.mxu1 %v1302_v29  ;;  %v99_v10 = vsub.s32 0, %v1643_v9  ;;  %v103_v12 = vsub.s32 1, %v1643_v9 }
  0x75   :  { %652 = vmatprep.subr.bf16.mxu0 %v1300_v27 }
  0x76   :  { %v100_v13 = vrot.slane %v95_v11, %v99_v10  ;;  %v104_v14 = vrot.slane %v95_v11, %v103_v12 }
  0x77   :  { %612 = vmatpush1.bf16.msra.mxu1 %v1307_v32 }
  0x78   :  { %653 = vmatpush1.bf16.msra.mxu0 %v1298_v30  ;;  %613 = vmatprep.subr.bf16.mxu1 %v1308_v33  ;;  %v1364_v33 = vld [vmem:[#allocation7] sm:$0xff]  }
  0x79   :  { %654 = vmatprep.subr.bf16.mxu0 %v1306_v31 }
  0x7b   :  { %614 = vmatpush1.bf16.msra.mxu1 %v1313_v36  ;;  %v1367_v36 = vld [vmem:[#allocation7 + $0xc8] sm:$0xff]  }
  0x7c   :  { %655 = vmatpush1.bf16.msra.mxu0 %v1304_v34  ;;  %615 = vmatprep.subr.bf16.mxu1 %v1314_v37  ;;  %v1365_v34 = vld [vmem:[#allocation7 + $0x80] sm:$0xff]   ;;  %v1368_v37 = vld [vmem:[#allocation7 + $0x8] sm:$0xff]  }
  0x7d   :  { %656 = vmatprep.subr.bf16.mxu0 %v1312_v35  ;;  %v1366_v35 = vld [vmem:[#allocation7 + $0x48] sm:$0xff]  }
  0x7f   :  { %616 = vmatpush1.bf16.msra.mxu1 %v1319_v40  ;;  %v1371_v40 = vld [vmem:[#allocation7 + $0xd0] sm:$0xff]  }
  0x80   :  { %657 = vmatpush1.bf16.msra.mxu0 %v1310_v38  ;;  %617 = vmatprep.subr.bf16.mxu1 %v1320_v42  ;;  %v1369_v38 = vld [vmem:[#allocation7 + $0x88] sm:$0xff]   ;;  %v1373_v42 = vld [vmem:[#allocation7 + $0x90] sm:$0xff]  }
  0x81   :  { %658 = vmatprep.subr.bf16.mxu0 %v1318_v39  ;;  %v1370_v39 = vld [vmem:[#allocation7 + $0x50] sm:$0xff]  }
  0x83   :  { %618 = vmatpush1.bf16.msra.mxu1 %v1325_v44  ;;  %v1375_v44 = vld [vmem:[#allocation7 + $0xd8] sm:$0xff]  }
  0x84   :  { %659 = vmatpush1.bf16.msra.mxu0 %v1316_v41  ;;  %619 = vmatprep.subr.bf16.mxu1 %v1326_v45  ;;  %v1372_v41 = vld [vmem:[#allocation7 + $0x10] sm:$0xff]   ;;  %v1376_v45 = vld [vmem:[#allocation7 + $0x18] sm:$0xff]  }
  0x85   :  { %660 = vmatprep.subr.bf16.mxu0 %v1324_v43  ;;  %v1374_v43 = vld [vmem:[#allocation7 + $0x58] sm:$0xff]  }
  0x87   :  { %620 = vmatpush1.bf16.msra.mxu1 %v1331_v48  ;;  %v1379_v48 = vld [vmem:[#allocation7 + $0xe0] sm:$0xff]  }
  0x88   :  { %661 = vmatpush1.bf16.msra.mxu0 %v1322_v46  ;;  %621 = vmatprep.subr.bf16.mxu1 %v1332_v49  ;;  %v1377_v46 = vld [vmem:[#allocation7 + $0x98] sm:$0xff]   ;;  %v1380_v49 = vld [vmem:[#allocation7 + $0x20] sm:$0xff]  }
  0x89   :  { %662 = vmatprep.subr.bf16.mxu0 %v1330_v47  ;;  %v1378_v47 = vld [vmem:[#allocation7 + $0x60] sm:$0xff]  }
  0x8b   :  { %622 = vmatpush1.bf16.msra.mxu1 %v1337_v52  ;;  %v1383_v52 = vld [vmem:[#allocation7 + $0xe8] sm:$0xff]  }
  0x8c   :  { %663 = vmatpush1.bf16.msra.mxu0 %v1328_v50  ;;  %623 = vmatprep.subr.bf16.mxu1 %v1338_v53  ;;  %v1381_v50 = vld [vmem:[#allocation7 + $0xa0] sm:$0xff]   ;;  %v1384_v53 = vld [vmem:[#allocation7 + $0x28] sm:$0xff]  }
  0x8d   :  { %664 = vmatprep.subr.bf16.mxu0 %v1336_v51  ;;  %v1382_v51 = vld [vmem:[#allocation7 + $0x68] sm:$0xff]  }
  0x8f   :  { %624 = vmatpush1.bf16.msra.mxu1 %v1343_v56  ;;  %v1387_v56 = vld [vmem:[#allocation7 + $0xf0] sm:$0xff]  }
  0x90   :  { %665 = vmatpush1.bf16.msra.mxu0 %v1334_v54  ;;  %625 = vmatprep.subr.bf16.mxu1 %v1344_v58  ;;  %v1385_v54 = vld [vmem:[#allocation7 + $0xa8] sm:$0xff]   ;;  %v1389_v58 = vld [vmem:[#allocation7 + $0xb0] sm:$0xff]  }
  0x91   :  { %666 = vmatprep.subr.bf16.mxu0 %v1342_v55  ;;  %v1386_v55 = vld [vmem:[#allocation7 + $0x70] sm:$0xff]  }
  0x93   :  { %626 = vmatpush1.bf16.msra.mxu1 %v1349_v61  ;;  %v1392_v61 = vld [vmem:[#allocation7 + $0x38] sm:$0xff]  }
  0x94   :  { %667 = vmatpush1.bf16.msra.mxu0 %v1340_v57  ;;  %627 = vmatprep.subr.bf16.mxu1 %v1350_v62  ;;  %v1388_v57 = vld [vmem:[#allocation7 + $0x30] sm:$0xff]   ;;  %v1393_v62 = vld [vmem:[#allocation7 + $0xb8] sm:$0xff]  }
  0x95   :  { %668 = vmatprep.subr.bf16.mxu0 %v1348_v59  ;;  %v1390_v59 = vld [vmem:[#allocation7 + $0x78] sm:$0xff]  }
  0x97   :  { %628 = vmatpush1.bf16.msra.mxu1 %v1355_v1  ;;  %v273_v1 = vsub.s32 3, %v1643_v9 }
  0x98   :  { %669 = vmatpush1.bf16.msra.mxu0 %v1346_v60  ;;  %629 = vmatprep.subr.bf16.mxu1 %v1356_v2  ;;  %v1391_v60 = vld [vmem:[#allocation7 + $0xf8] sm:$0xff]  }
  0x99   :  { %670 = vmatprep.subr.bf16.mxu0 %v1354_v63  ;;  %v269_v63 = vsub.s32 2, %v1643_v9 }
  0x9b   :  { %630 = vmatpush1.bf16.msra.mxu1 %v1361_v5 }
  0x9c   :  { %671 = vmatpush1.bf16.msra.mxu0 %v1352_v0  ;;  %1205 = vmatprep.subr.bf16.mxu1 %v1362_v6  ;;  %v257_v0 = vld [vmem:[#allocation6] sm:$0xf] }
  0x9d   :  { %672 = vmatprep.subr.bf16.mxu0 %v1360_v4  ;;  %v262_v2 = vrot.slane %v257_v0, %v99_v10  ;;  %v266_v4 = vrot.slane %v257_v0, %v103_v12  ;;  %v274_v5 = vrot.slane %v257_v0, %v273_v1 }
  0xa0   :  { %673 = vmatpush1.bf16.msra.mxu0 %v1358_v3  ;;  %v270_v3 = vrot.slane %v257_v0, %v269_v63 }
  0xa1   :  { %1227 = vmatprep.subr.bf16.mxu0 %v1363_v7 }
 0x136   :  { %v170_v15 = vpop.f32.mrb[0].mxu0 }
 0x137   :  { %v171_v16 = vadd.f32 %v170_v15, %v100_v13  ;;  %v172_v17 = vpop.f32.mrb[1].mxu0 }
 0x138   :  { %v173_v18 = vadd.f32 %v172_v17, %v104_v14  ;;  %v174_v19 = vpop.f32.mrb[2].mxu0 }
 0x139   :  { %v183_v20 = vmul.f32 0.01, %v171_v16  ;;  %v175_v21 = vadd.f32 %v174_v19, %v100_v13  ;;  %v176_v22 = vpop.f32.mrb[3].mxu0  ;;  %vm179_vm1 = vcmp.gt.f32.partialorder %v171_v16, 0.0 }
 0x13a   :  { %v184_v23 = vmul.f32 0.01, %v173_v18  ;;  %v177_v24 = vadd.f32 %v176_v22, %v104_v14  ;;  %vm180_vm3 = vcmp.gt.f32.partialorder %v173_v18, 0.0 }
 0x13b   :  { %vm181_vm2 = vcmp.gt.f32.partialorder %v175_v21, 0.0  ;;  %v185_v25 = vmul.f32 0.01, %v175_v21  ;;  %v187_v27 = vsel %vm179_vm1, %v171_v16, %v183_v20 }
 0x13c   :  { %v186_v26 = vmul.f32 0.01, %v177_v24  ;;  %vm182_vm4 = vcmp.gt.f32.partialorder %v177_v24, 0.0  ;;  %v188_v29 = vsel %vm180_vm3, %v173_v18, %v184_v23 }
 0x13d   :  { %v189_v28 = vsel %vm181_vm2, %v175_v21, %v185_v25 }
 0x13e   :  { %v190_v30 = vsel %vm182_vm4, %v177_v24, %v186_v26  ;;  %v191_v31 = vpack.c.bf16 %v189_v28, %v187_v27 }
 0x13f   :  { %v192_v32 = vpack.c.bf16 %v190_v30, %v188_v29 }
 0x141   :  { %631 = vmatprep.mubr.bf16.mxu1 %v192_v32  ;;  %674 = vmatprep.mubr.bf16.mxu0 %v192_v32 }
 0x142   :  { %632 = vmatmul.mubr.bf16.vlgmr.msra.gmra.mrb[0].mxu1 %v191_v31  ;;  %675 = vmatmul.mubr.bf16.vlgmr.msra.gmra.mrb[4].mxu0 %v191_v31 }
 0x143   :  { %1206 = vmatpush3.bf16.msra.mxu1 %v1364_v33  ;;  %1228 = vmatpush3.bf16.msra.mxu0 %v1365_v34 }
 0x144   :  { %1207 = vmatprep.subr.bf16.mxu1 %v1366_v35  ;;  %1229 = vmatprep.subr.bf16.mxu0 %v1367_v36 }
 0x147   :  { %1208 = vmatpush3.bf16.msra.mxu1 %v1368_v37  ;;  %1230 = vmatpush3.bf16.msra.mxu0 %v1369_v38 }
 0x148   :  { %1209 = vmatprep.subr.bf16.mxu1 %v1370_v39  ;;  %1231 = vmatprep.subr.bf16.mxu0 %v1371_v40 }
 0x14b   :  { %1210 = vmatpush3.bf16.msra.mxu1 %v1372_v41  ;;  %1232 = vmatpush3.bf16.msra.mxu0 %v1373_v42 }
 0x14c   :  { %1211 = vmatprep.subr.bf16.mxu1 %v1374_v43  ;;  %1233 = vmatprep.subr.bf16.mxu0 %v1375_v44  ;;  %v1163_v44 = vld [vmem:[#allocation9] ss:$0 sm:$0xff] }
 0x14f   :  { %1212 = vmatpush3.bf16.msra.mxu1 %v1376_v45  ;;  %1234 = vmatpush3.bf16.msra.mxu0 %v1377_v46 }
 0x150   :  { %1213 = vmatprep.subr.bf16.mxu1 %v1378_v47  ;;  %1235 = vmatprep.subr.bf16.mxu0 %v1379_v48 }
 0x153   :  { %1214 = vmatpush3.bf16.msra.mxu1 %v1380_v49  ;;  %1236 = vmatpush3.bf16.msra.mxu0 %v1381_v50 }
 0x154   :  { %1215 = vmatprep.subr.bf16.mxu1 %v1382_v51  ;;  %1237 = vmatprep.subr.bf16.mxu0 %v1383_v52 }
 0x157   :  { %1216 = vmatpush3.bf16.msra.mxu1 %v1384_v53  ;;  %1238 = vmatpush3.bf16.msra.mxu0 %v1385_v54 }
 0x158   :  { %1217 = vmatprep.subr.bf16.mxu1 %v1386_v55  ;;  %1239 = vmatprep.subr.bf16.mxu0 %v1387_v56 }
 0x15b   :  { %1218 = vmatpush3.bf16.msra.mxu1 %v1388_v57  ;;  %1240 = vmatpush3.bf16.msra.mxu0 %v1389_v58 }
 0x15c   :  { %1219 = vmatprep.subr.bf16.mxu1 %v1390_v59  ;;  %1241 = vmatprep.subr.bf16.mxu0 %v1391_v60 }
 0x15f   :  { %1220 = vmatpush3.bf16.msra.mxu1 %v1392_v61  ;;  %1242 = vmatpush3.bf16.msra.mxu0 %v1393_v62 }
 0x215   :  { %v633_v6 = vpop.f32.mrb[0].mxu1  ;;  %v676_v7 = vpop.f32.mrb[4].mxu0 }
 0x216   :  { %v634_v8 = vadd.f32 %v633_v6, %v262_v2  ;;  %v677_v11 = vadd.f32 %v676_v7, %v270_v3  ;;  %v635_v13 = vpop.f32.mrb[1].mxu1  ;;  %v678_v14 = vpop.f32.mrb[5].mxu0 }
 0x217   :  { %v636_v15 = vadd.f32 %v635_v13, %v266_v4  ;;  %v679_v16 = vadd.f32 %v678_v14, %v274_v5  ;;  %v637_v17 = vpop.f32.mrb[2].mxu1  ;;  %v680_v18 = vpop.f32.mrb[6].mxu0 }
 0x218   :  { %vm685_vm5 = vcmp.gt.f32.partialorder %v634_v8, 0.0  ;;  %v693_v19 = vmul.f32 0.01, %v634_v8  ;;  %vm687_vm6 = vcmp.gt.f32.partialorder %v677_v11, 0.0  ;;  %v695_v20 = vmul.f32 0.01, %v677_v11 }
 0x219   :  { %vm686_vm7 = vcmp.gt.f32.partialorder %v636_v15, 0.0  ;;  %v694_v10 = vmul.f32 0.01, %v636_v15  ;;  %vm688_vm8 = vcmp.gt.f32.partialorder %v679_v16, 0.0  ;;  %v696_v9 = vmul.f32 0.01, %v679_v16 }
 0x21a   :  { %v638_v12 = vadd.f32 %v637_v17, %v262_v2  ;;  %v681_v21 = vadd.f32 %v680_v18, %v270_v3  ;;  %v639_v22 = vpop.f32.mrb[3].mxu1  ;;  %v682_v23 = vpop.f32.mrb[7].mxu0  ;;  %v701_v24 = vsel %vm685_vm5, %v634_v8, %v693_v19  ;;  %v703_v25 = vsel %vm687_vm6, %v677_v11, %v695_v20 }
 0x21b   :  { %v640_v26 = vadd.f32 %v639_v22, %v266_v4  ;;  %v683_v27 = vadd.f32 %v682_v23, %v274_v5  ;;  %v702_v34 = vsel %vm686_vm7, %v636_v15, %v694_v10  ;;  %v704_v35 = vsel %vm688_vm8, %v679_v16, %v696_v9 }
 0x21c   :  { %vm689_vm9 = vcmp.gt.f32.partialorder %v638_v12, 0.0  ;;  %v697_v28 = vmul.f32 0.01, %v638_v12  ;;  %vm691_vm10 = vcmp.gt.f32.partialorder %v681_v21, 0.0  ;;  %v699_v29 = vmul.f32 0.01, %v681_v21 }
 0x21d   :  { %vm690_vm11 = vcmp.gt.f32.partialorder %v640_v26, 0.0  ;;  %v698_v30 = vmul.f32 0.01, %v640_v26  ;;  %vm692_vm12 = vcmp.gt.f32.partialorder %v683_v27, 0.0  ;;  %v700_v31 = vmul.f32 0.01, %v683_v27 }
 0x21e   :  { %v705_v32 = vsel %vm689_vm9, %v638_v12, %v697_v28  ;;  %v707_v33 = vsel %vm691_vm10, %v681_v21, %v699_v29 }
 0x21f   :  { %v709_v36 = vpack.c.bf16 %v705_v32, %v701_v24  ;;  %v711_v37 = vpack.c.bf16 %v707_v33, %v703_v25  ;;  %v706_v38 = vsel %vm690_vm11, %v640_v26, %v698_v30  ;;  %v708_v39 = vsel %vm692_vm12, %v683_v27, %v700_v31 }
 0x220   :  { %v710_v40 = vpack.c.bf16 %v706_v38, %v702_v34  ;;  %v712_v41 = vpack.c.bf16 %v708_v39, %v704_v35 }
 0x222   :  { %1008 = vmatprep.mubr.bf16.mxu1 %v710_v40  ;;  %1049 = vmatprep.mubr.bf16.mxu0 %v712_v41 }
 0x223   :  { %1009 = vmatmul.mubr.bf16.vlgmr.msra.gmra.mrb[4].mxu1 %v709_v36  ;;  %1050 = vmatmul.mubr.bf16.vlgmr.msra.gmra.mrb[8].mxu0 %v711_v37 }
 0x2f6   :  { %v1221_v42 = vpop.f32.mrb[4].mxu1  ;;  %v1243_v43 = vpop.f32.mrb[8].mxu0 }
 0x2f7   :  { %v1222_v45 = vpop.f32.mrb[5].mxu1  ;;  %v1244_v46 = vpop.f32.mrb[9].mxu0 }
 0x2f8   :  { %v1223_v47 = vadd.f32 %v1222_v45, %v1221_v42  ;;  %v1245_v48 = vadd.f32 %v1244_v46, %v1243_v43  ;;  %v1224_v49 = vpop.f32.mrb[6].mxu1  ;;  %v1246_v50 = vpop.f32.mrb[10].mxu0 }
 0x2f9   :  { %v1225_v51 = vpop.f32.mrb[7].mxu1  ;;  %v1247_v52 = vpop.f32.mrb[11].mxu0 }
 0x2fa   :  { %v1011_v53 = vadd.f32 %v1223_v47, %v1163_v44  ;;  %v1226_v54 = vadd.f32 %v1225_v51, %v1224_v49  ;;  %v1248_v55 = vadd.f32 %v1247_v52, %v1246_v50 }
 0x2fc   :  { %v1014_v56 = vadd.f32 %v1226_v54, %v1163_v44  ;;  %v1052_v57 = vadd.f32 %v1245_v48, %v1011_v53 }
 0x2fe   :  { %1058 = vmax.xlane.f32.xlu0 %v1052_v57  ;;  %v1055_v58 = vadd.f32 %v1248_v55, %v1014_v56 }
 0x302   :  { %1060 = vmax.xlane.f32.xlu0 %v1055_v58 }
 0x38b   :  { %v1059_v59 = vpop.xlane.xlu0 %1058 }
 0x38c   :  { %v1062_v60 = vsub.f32 %v1052_v57, %v1059_v59 }
 0x38e   :  { %v1064_v61 = vmul.f32 1.442695, %v1062_v60 }
 0x38f   :  { %v1061_v62 = vpop.xlane.xlu0 %1060 }
 0x390   :  { %1394 = vpow2.f32 %v1064_v61  ;;  %v1063_v63 = vsub.f32 %v1055_v58, %v1061_v62 }
 0x392   :  { %v1066_v0 = vmul.f32 1.442695, %v1063_v63 }
 0x394   :  { %1396 = vpow2.f32 %v1066_v0 }
 0x39a   :  { %v1395_v1 = vpop.eup %1394 }
 0x39b   :  { %1068 = vadd.xlane.f32.xlu1 %v1395_v1 }
 0x39e   :  { %v1397_v2 = vpop.eup %1396 }
 0x39f   :  { %1070 = vadd.xlane.f32.xlu1 %v1397_v2 }
 0x428   :  { %v1069_v3 = vpop.xlane.xlu1 %1068 }
 0x429   :  { %1398 = vrcp.f32 %v1069_v3 }
 0x42c   :  { %v1071_v4 = vpop.xlane.xlu1 %1070 }
 0x42d   :  { %1400 = vrcp.f32 %v1071_v4 }
 0x433   :  { %v1399_v5 = vpop.eup %1398 }
 0x434   :  { %v1073_v7 = vmul.f32 %v1399_v5, %v1395_v1 }
 0x437   :  { %v1401_v6 = vpop.eup %1400 }
 0x438   :  { %v1075_v8 = vmul.f32 %v1401_v6, %v1397_v2 }
 0x43a   :  { %v1203_v11 = vpack.c.bf16 %v1075_v8, %v1073_v7 }
 0x43c   :  { %1204 = vst [vmem:[%s1669_s7] sm:$0xff] %v1203_v11  }
 0x43d   :  { %1090 = vsyncpa [#allocation3], 1 }
 0x43e   :  { %1091 = vsyncpa [#allocation5], 1 }
 0x43f   :  { %1092 = vsyncpa [#allocation8], 1 }

</bundles_post_ra>
